<compile_context>
chip_gen: v7x
topology: tpu7x:2x2x1
jax: 0.10.0
libtpu: 0.0.40
codegen_flags: <defaults>
</compile_context>

<pallas_src>
import functools
import math

import numpy as np
import jax
import jax.numpy as jnp
from jax import lax
from jax.experimental import pallas as pl
from jax.experimental.pallas import tpu as pltpu

EPS = 1e-8
VMEM_LIMIT_BYTES = 32 * 1024 * 1024   # explicit scoped-VMEM budget (fits v5e/v6e/v7x)


def _round_up(v, m):
    return ((v + m - 1) // m) * m


# ------------------------------ kernel helpers -------------------------------
def _relu_normalize(h, approx):
    """ReLU followed by L2 row normalization (uhg.normalize assumption)."""
    h = jnp.maximum(h, 0.0)
    norm = jnp.sqrt(jnp.sum(h * h, axis=-1, keepdims=True))
    # EUP reciprocal; approx=True (fast_math path) makes it nearly free.
    return h * pl.reciprocal(norm + EPS, approx=approx)


def _sigmoid(x, approx):
    # Implemented manually (EUP exp + reciprocal) to keep the Mosaic lowering simple.
    return pl.reciprocal(1.0 + jnp.exp(-x), approx=approx)


def _accumulate_messages(adj_ref, ht_ref, sqt_ref, hs_ref, sqs_ref, acc_ref, mm_dtype):
    """One (row_tile, col_tile) step of the dense message pass.

    acc[j] += sum_i adj[j, i] * exp(-||h_j - h_i||) * h[i]   (i over this col tile)
    """
    ht = ht_ref[...].astype(mm_dtype)           # [tm, F] target features (rows j)
    hs = hs_ref[...].astype(mm_dtype)           # [tn, F] source features (cols i)

    # Gram matrix on the MXU, contracting the feature axis of BOTH operands
    # -> no [tn, F] activation transpose is materialized.
    gram = lax.dot_general(ht, hs, (((1,), (1,)), ((), ())),
                           preferred_element_type=jnp.float32)          # [tm, tn]

    # Pairwise squared distances from the precomputed f32 row norms (no per-tile
    # O(tile*F) reductions / narrow transposes; carries the ACTUAL norm, so rows that
    # zeroed out after ReLU (||h||^2 = 0) are handled exactly).
    d2 = jnp.maximum(sqt_ref[...] + sqs_ref[...] - 2.0 * gram, 0.0)     # [tm, tn]
    dist = jnp.sqrt(d2)

    # exp at mm_dtype: bf16 under fast_math (bf16 EUP on v6e/v7x; upconverted on v5e).
    # adj is streamed bf16 (exact for edge counts <= 256); second NxN matmul runs at
    # bf16 MXU rate with f32 accumulation under fast_math.
    wgt = adj_ref[...].astype(mm_dtype) * jnp.exp((-dist).astype(mm_dtype))
    acc_ref[...] += jnp.dot(wgt, hs, preferred_element_type=jnp.float32)


# --------------------------------- kernels -----------------------------------
def input_kernel(x_ref, w_ref, b_ref, h_ref, sq_ref, *, approx):
    # input_transform -> ReLU -> normalize; also emit ||h||^2 for the next message pass.
    h = jnp.dot(x_ref[...], w_ref[...], preferred_element_type=jnp.float32) + b_ref[...]
    h = _relu_normalize(h, approx)
    h_ref[...] = h.astype(h_ref.dtype)
    sq_ref[...] = jnp.sum(h * h, axis=-1, keepdims=True)


def mp_hidden_kernel(nnz_ref, adj_ref, ht_ref, sqt_ref, hs_ref, sqs_ref, w_ref, b_ref,
                     h_ref, sq_ref, acc_ref, *, approx, mm_dtype):
    # message pass (tiled reduction over col tiles) + fused hidden linear epilogue
    c = pl.program_id(1)
    ncol = pl.num_programs(1)

    @pl.when(c == 0)
    def _():
        acc_ref[...] = jnp.zeros_like(acc_ref)

    # Block-sparsity: all-zero adjacency tiles skip the MXU/EUP work entirely.
    @pl.when(nnz_ref[pl.program_id(0) * ncol + c] > 0)
    def _():
        _accumulate_messages(adj_ref, ht_ref, sqt_ref, hs_ref, sqs_ref, acc_ref, mm_dtype)

    @pl.when(c == ncol - 1)
    def _():
        h = jnp.dot(acc_ref[...], w_ref[...], preferred_element_type=jnp.float32) + b_ref[...]
        h = _relu_normalize(h, approx)
        h_ref[...] = h.astype(h_ref.dtype)
        sq_ref[...] = jnp.sum(h * h, axis=-1, keepdims=True)


def mp_classifier_kernel(nnz_ref, adj_ref, ht_ref, sqt_ref, hs_ref, sqs_ref,
                         w_ref, b_ref, wc1_ref, bc1_ref, wc2_ref, bc2_ref,
                         out_ref, acc_ref, *, approx, mm_dtype):
    # message pass + fused hidden2 + classifier + sigmoid epilogue
    c = pl.program_id(1)
    ncol = pl.num_programs(1)

    @pl.when(c == 0)
    def _():
        acc_ref[...] = jnp.zeros_like(acc_ref)

    @pl.when(nnz_ref[pl.program_id(0) * ncol + c] > 0)
    def _():
        _accumulate_messages(adj_ref, ht_ref, sqt_ref, hs_ref, sqs_ref, acc_ref, mm_dtype)

    @pl.when(c == ncol - 1)
    def _():
        h = jnp.dot(acc_ref[...], w_ref[...], preferred_element_type=jnp.float32) + b_ref[...]
        h = _relu_normalize(h, approx)                                         # [tm, 64]
        c1 = jnp.maximum(
            jnp.dot(h, wc1_ref[...], preferred_element_type=jnp.float32) + bc1_ref[...], 0.0)
        # Dropout(0.3): identity at inference.
        # Linear(32, 1) as a VPU reduction instead of a 1-wide MXU matmul.
        logits = jnp.sum(c1 * wc2_ref[...], axis=-1, keepdims=True) + bc2_ref[...]
        out_ref[...] = _sigmoid(logits, approx)


# --------------------------------- wrapper -----------------------------------
def uhg_forward(x, adj, params, *, block_rows=512, block_cols=1024, fast_math=False):
    """adj[j, i] = #edges with row=i, col=j (dense [N, N], streamed tile-by-tile)."""
    n, f_in = x.shape
    assert adj.shape == (n, n)
    assert block_rows % 128 == 0 and block_cols % 128 == 0

    # --- padding & tile selection (tiles collapse for small N; pad so blocks divide) ---
    n_lane = _round_up(n, 128)
    tm = min(block_rows, n_lane)
    tn = min(block_cols, n_lane)
    n_pad = _round_up(n, math.lcm(tm, tn))
    if n_pad != n:
        x = jnp.pad(x, ((0, n_pad - n), (0, 0)))
        adj = jnp.pad(adj, ((0, n_pad - n), (0, n_pad - n)))
    # adj streamed bf16: halves the dominant N^2 HBM traffic; exact for edge counts <= 256.
    adj = adj.astype(jnp.bfloat16)

    mm_dtype = jnp.bfloat16 if fast_math else jnp.float32
    act_dtype = jnp.bfloat16 if fast_math else jnp.float32   # h0/h1 stream width
    approx = fast_math

    nrow, ncol = n_pad // tm, n_pad // tn
    # Per-(row-tile, col-tile) nnz table, scalar-prefetched into SMEM (flattened 1D).
    nnz = (adj != 0).reshape(nrow, tm, ncol, tn).sum(axis=(1, 3)).astype(jnp.int32).reshape(-1)

    cp_rows = pltpu.CompilerParams(dimension_semantics=("parallel",),
                                   vmem_limit_bytes=VMEM_LIMIT_BYTES)
    cp_mp = pltpu.CompilerParams(dimension_semantics=("parallel", "arbitrary"),
                                 vmem_limit_bytes=VMEM_LIMIT_BYTES)

    # Host-side pre-transpose of PyTorch [out,in] weights -> [in,out] (straight MXU feed).
    w_in_t = params["w_in"].T          # [f_in, 128]
    w_h1_t = params["w_h1"].T          # [128, 128]
    w_h2_t = params["w_h2"].T          # [128, 64]
    w_c1_t = params["w_c1"].T          # [64, 32]
    w_c2 = params["w_c2"]              # [1, 32]  row layout for the VPU reduction tail

    # ---- input_transform -> ReLU -> normalize (+ row-norm side output) ------
    h0, sq0 = pl.pallas_call(
        functools.partial(input_kernel, approx=approx),
        out_shape=(jax.ShapeDtypeStruct((n_pad, 128), act_dtype),
                   jax.ShapeDtypeStruct((n_pad, 1), jnp.float32)),
        grid_spec=pltpu.PrefetchScalarGridSpec(
            num_scalar_prefetch=0,
            grid=(nrow,),
            in_specs=[pl.BlockSpec((tm, f_in), lambda r: (r, 0)),
                      pl.BlockSpec((f_in, 128), lambda r: (0, 0)),
                      pl.BlockSpec((1, 128), lambda r: (0, 0))],
            out_specs=[pl.BlockSpec((tm, 128), lambda r: (r, 0)),
                       pl.BlockSpec((tm, 1), lambda r: (r, 0))]),
        compiler_params=cp_rows,
    )(x, w_in_t, params["b_in"])
    sq0_row = sq0.reshape(1, n_pad)    # tiny one-shot relayout outside the tile loops

    def mp_grid_spec(extra_in_specs, out_specs):
        return pltpu.PrefetchScalarGridSpec(
            num_scalar_prefetch=1,                     # nnz table -> SMEM
            grid=(nrow, ncol),                         # col axis = innermost reduction
            in_specs=[pl.BlockSpec((tm, tn), lambda r, c, nz: (r, c)),    # adj tile (bf16)
                      pl.BlockSpec((tm, 128), lambda r, c, nz: (r, 0)),   # target feats
                      pl.BlockSpec((tm, 1), lambda r, c, nz: (r, 0)),     # target ||h||^2
                      pl.BlockSpec((tn, 128), lambda r, c, nz: (c, 0)),   # source feats
                      pl.BlockSpec((1, tn), lambda r, c, nz: (0, c)),     # source ||h||^2 (row)
                      ] + extra_in_specs,
            out_specs=out_specs,
            scratch_shapes=[pltpu.VMEM((tm, 128), jnp.float32)])          # f32 accumulator

    # ---- message pass 1 + hidden1 -> ReLU -> normalize (fused epilogue) -----
    h1, sq1 = pl.pallas_call(
        functools.partial(mp_hidden_kernel, approx=approx, mm_dtype=mm_dtype),
        out_shape=(jax.ShapeDtypeStruct((n_pad, 128), act_dtype),
                   jax.ShapeDtypeStruct((n_pad, 1), jnp.float32)),
        grid_spec=mp_grid_spec(
            [pl.BlockSpec((128, 128), lambda r, c, nz: (0, 0)),           # w_h1^T
             pl.BlockSpec((1, 128), lambda r, c, nz: (0, 0))],            # b_h1
            [pl.BlockSpec((tm, 128), lambda r, c, nz: (r, 0)),
             pl.BlockSpec((tm, 1), lambda r, c, nz: (r, 0))]),
        compiler_params=cp_mp,
    )(nnz, adj, h0, sq0, h0, sq0_row, w_h1_t, params["b_h1"])
    sq1_row = sq1.reshape(1, n_pad)

    # ---- message pass 2 + hidden2 + classifier + sigmoid (fused epilogue) ---
    out = pl.pallas_call(
        functools.partial(mp_classifier_kernel, approx=approx, mm_dtype=mm_dtype),
        out_shape=jax.ShapeDtypeStruct((n_pad, 1), jnp.float32),
        grid_spec=mp_grid_spec(
            [pl.BlockSpec((128, 64), lambda r, c, nz: (0, 0)),            # w_h2^T
             pl.BlockSpec((1, 64), lambda r, c, nz: (0, 0)),              # b_h2
             pl.BlockSpec((64, 32), lambda r, c, nz: (0, 0)),             # w_c1^T
             pl.BlockSpec((1, 32), lambda r, c, nz: (0, 0)),              # b_c1
             pl.BlockSpec((1, 32), lambda r, c, nz: (0, 0)),              # w_c2 (row)
             pl.BlockSpec((1, 1), lambda r, c, nz: (0, 0))],              # b_c2
            pl.BlockSpec((tm, 1), lambda r, c, nz: (r, 0))),
        compiler_params=cp_mp,
    )(nnz, adj, h1, sq1, h1, sq1_row, w_h2_t, params["b_h2"],
      w_c1_t, params["b_c1"], w_c2, params["b_c2"])

    return out[:n]


# -------------------------- pure-JAX edge-loop reference ---------------------
def reference_forward(x, row, col, params):
    hp = jax.lax.Precision.HIGHEST

    def linear(h, w, b):
        return jnp.dot(h, w.T, precision=hp) + b

    def relu_normalize(h):
        h = jnp.maximum(h, 0.0)
        return h / (jnp.linalg.norm(h, axis=-1, keepdims=True) + EPS)

    def message_pass(xn):
        agg = jnp.zeros_like(xn)
        for e in range(row.shape[0]):
            s = xn[row[e]]
            t = xn[col[e]]
            dist = jnp.sqrt(jnp.maximum(jnp.sum((s - t) ** 2), 0.0))
            agg = agg.at[col[e]].add(s * jnp.exp(-dist))
        return agg

    h = relu_normalize(linear(x, params["w_in"], params["b_in"]))
    h = relu_normalize(linear(message_pass(h), params["w_h1"], params["b_h1"]))
    h = relu_normalize(linear(message_pass(h), params["w_h2"], params["b_h2"]))
    c = jnp.maximum(linear(h, params["w_c1"], params["b_c1"]), 0.0)
    return jax.nn.sigmoid(linear(c, params["w_c2"], params["b_c2"]))


# ------------------------------- setup / main --------------------------------
def make_params(key, num_features):
    def linear_params(k, fan_in, fan_out):
        k1, k2 = jax.random.split(k)
        bound = 1.0 / np.sqrt(fan_in)
        w = jax.random.uniform(k1, (fan_out, fan_in), jnp.float32, -bound, bound)
        b = jax.random.uniform(k2, (1, fan_out), jnp.float32, -bound, bound)
        return w, b

    keys = jax.random.split(key, 5)
    p = {}
    p["w_in"], p["b_in"] = linear_params(keys[0], num_features, 128)
    p["w_h1"], p["b_h1"] = linear_params(keys[1], 128, 128)
    p["w_h2"], p["b_h2"] = linear_params(keys[2], 128, 64)
    p["w_c1"], p["b_c1"] = linear_params(keys[3], 64, 32)
    p["w_c2"], p["b_c2"] = linear_params(keys[4], 32, 1)
    return p


if __name__ == "__main__":
    num_nodes = 8
    num_features = 16

    key = jax.random.PRNGKey(0)
    k_x, k_p = jax.random.split(key)
    x = jax.random.normal(k_x, (num_nodes, num_features), jnp.float32)

    # small deterministic directed graph (edge_index = [row, col])
    row = jnp.array([0, 1, 2, 3, 4, 5, 6, 7, 0, 2, 4, 6], dtype=jnp.int32)
    col = jnp.array([1, 2, 3, 4, 5, 6, 7, 0, 3, 5, 7, 1], dtype=jnp.int32)

    # dense adjacency-count matrix for the kernel: adj[j, i] = #edges with row=i, col=j
    adj = jnp.zeros((num_nodes, num_nodes), jnp.float32).at[col, row].add(1.0)

    params = make_params(k_p, num_features)
    ref = reference_forward(x, row, col, params)

    # f32 path (typically matches the edge-loop reference to ~1e-5; tolerance left loose
    # to absorb matmul-pass differences between XLA and Mosaic).
    out = jax.block_until_ready(uhg_forward(x, adj, params, fast_math=False))
    np.testing.assert_allclose(np.asarray(out), np.asarray(ref), rtol=5e-3, atol=5e-4)

    # fast_math path (bf16 activations/adj/exp + approx EUP reciprocal): loose by design.
    out_fast = jax.block_until_ready(uhg_forward(x, adj, params, fast_math=True))
    np.testing.assert_allclose(np.asarray(out_fast), np.asarray(ref), rtol=1e-1, atol=5e-2)

    print("KERNEL_OK")
</pallas_src>

<mosaic_0001>
module attributes {stable_mosaic.version = 11 : i64} {
  func.func @input_kernel(%arg0: i32, %arg1: memref<128x16xf32, #tpu.memory_space<vmem>>, %arg2: memref<16x128xf32, #tpu.memory_space<vmem>>, %arg3: memref<1x128xf32, #tpu.memory_space<vmem>>, %arg4: memref<128x128xf32, #tpu.memory_space<vmem>>, %arg5: memref<128x1xf32, #tpu.memory_space<vmem>>) attributes {dimension_semantics = [#tpu.dimension_semantics<parallel>], iteration_bounds = array<i64: 1>, scalar_prefetch = 0 : i64, scratch_operands = 0 : i64, tpu.core_type = #tpu.core_type<tc>, window_params = [{transform_indices = @transform_0, window_bounds = array<i64: 128, 16>}, {pipeline_mode = #tpu.pipeline_mode<synchronous>, transform_indices = @transform_1, window_bounds = array<i64: 16, 128>}, {pipeline_mode = #tpu.pipeline_mode<synchronous>, transform_indices = @transform_2, window_bounds = array<i64: 1, 128>}, {transform_indices = @transform_3, window_bounds = array<i64: 128, 128>}, {transform_indices = @transform_4, window_bounds = array<i64: 128, 1>}]} {
    %c0 = arith.constant 0 : index
    %c0_0 = arith.constant 0 : index
    %0 = vector.load %arg1[%c0, %c0_0] : memref<128x16xf32, #tpu.memory_space<vmem>>, vector<128x16xf32>
    %c0_1 = arith.constant 0 : index
    %c0_2 = arith.constant 0 : index
    %1 = vector.load %arg2[%c0_1, %c0_2] : memref<16x128xf32, #tpu.memory_space<vmem>>, vector<16x128xf32>
    %cst = arith.constant dense<0.000000e+00> : vector<128x128xf32>
    %2 = tpu.matmul %0, %1, %cst {dimension_numbers = #tpu.dot_dimension_numbers<[1], [0], [0], [1], [0, 0, 1, 1], [], []>} : vector<128x16xf32>, vector<16x128xf32>, vector<128x128xf32> -> vector<128x128xf32>
    %c0_3 = arith.constant 0 : index
    %c0_4 = arith.constant 0 : index
    %3 = vector.load %arg3[%c0_3, %c0_4] : memref<1x128xf32, #tpu.memory_space<vmem>>, vector<1x128xf32>
    %4 = vector.broadcast %3 : vector<1x128xf32> to vector<128x128xf32>
    %5 = arith.addf %2, %4 : vector<128x128xf32>
    %cst_5 = arith.constant 0.000000e+00 : f32
    %6 = vector.broadcast %cst_5 : f32 to vector<128x128xf32>
    %7 = arith.maximumf %5, %6 : vector<128x128xf32>
    %8 = arith.mulf %7, %7 : vector<128x128xf32>
    %cst_6 = arith.constant dense<0.000000e+00> : vector<128xf32>
    %9 = vector.multi_reduction <add>, %8, %cst_6 [1] : vector<128x128xf32> to vector<128xf32>
    %10 = vector.shape_cast %9 : vector<128xf32> to vector<128x1xf32>
    %11 = math.sqrt %10 : vector<128x1xf32>
    %cst_7 = arith.constant 9.99999993E-9 : f32
    %12 = vector.broadcast %cst_7 : f32 to vector<128x1xf32>
    %13 = arith.addf %11, %12 : vector<128x1xf32>
    %14 = tpu.reciprocal %13 : vector<128x1xf32> -> vector<128x1xf32>
    %15 = vector.broadcast %14 : vector<128x1xf32> to vector<128x128xf32>
    %16 = arith.mulf %7, %15 : vector<128x128xf32>
    %c0_8 = arith.constant 0 : index
    %c0_9 = arith.constant 0 : index
    %17 = vector.load %arg4[%c0_8, %c0_9] : memref<128x128xf32, #tpu.memory_space<vmem>>, vector<128x128xf32>
    tpu.vector_store %arg4[%c0_8, %c0_9], %16 {strides = array<i32>} : memref<128x128xf32, #tpu.memory_space<vmem>>, vector<128x128xf32>,
    %18 = arith.mulf %16, %16 : vector<128x128xf32>
    %cst_10 = arith.constant dense<0.000000e+00> : vector<128xf32>
    %19 = vector.multi_reduction <add>, %18, %cst_10 [1] : vector<128x128xf32> to vector<128xf32>
    %20 = vector.shape_cast %19 : vector<128xf32> to vector<128x1xf32>
    %c0_11 = arith.constant 0 : index
    %c0_12 = arith.constant 0 : index
    %21 = vector.load %arg5[%c0_11, %c0_12] : memref<128x1xf32, #tpu.memory_space<vmem>>, vector<128x1xf32>
    tpu.vector_store %arg5[%c0_11, %c0_12], %20 {strides = array<i32>} : memref<128x1xf32, #tpu.memory_space<vmem>>, vector<128x1xf32>,
    return
  }
  func.func @transform_0(%arg0: i32) -> (i32, i32) {
    %c0_i32 = arith.constant 0 : i32
    %c0_i32_0 = arith.constant 0 : i32
    return %arg0, %c0_i32 : i32, i32
  }
  func.func @transform_1(%arg0: i32) -> (i32, i32) {
    %c0_i32 = arith.constant 0 : i32
    %c0_i32_0 = arith.constant 0 : i32
    %c0_i32_1 = arith.constant 0 : i32
    return %c0_i32, %c0_i32_0 : i32, i32
  }
  func.func @transform_2(%arg0: i32) -> (i32, i32) {
    %c0_i32 = arith.constant 0 : i32
    %c0_i32_0 = arith.constant 0 : i32
    %c0_i32_1 = arith.constant 0 : i32
    return %c0_i32, %c0_i32_0 : i32, i32
  }
  func.func @transform_3(%arg0: i32) -> (i32, i32) {
    %c0_i32 = arith.constant 0 : i32
    %c0_i32_0 = arith.constant 0 : i32
    return %arg0, %c0_i32 : i32, i32
  }
  func.func @transform_4(%arg0: i32) -> (i32, i32) {
    %c0_i32 = arith.constant 0 : i32
    %c0_i32_0 = arith.constant 0 : i32
    return %arg0, %c0_i32 : i32, i32
  }
}

</mosaic_0001>

<bundles_post_ra>
// kernel: tpu_custom_call.1
= control target key start
LH: loop header
LB: loop body
LE: loop exit
PB: predicated region body
PF: predicated region fallthrough
CT: control target
= control target key end

     0   :  { %vm42_vm0 = vcmask 130048   ;;  %s1154_s0 = inlined_call_operand.vmem [shape: f32[128,16], index: 0, kind: input, shape index: {}]   ;;  %s1155_s1 = inlined_call_operand.vmem [shape: f32[16,128], index: 1, kind: input, shape index: {}]   ;;  %s1156_s2 = inlined_call_operand.vmem [shape: f32[1,128], index: 2, kind: input, shape index: {}]   ;;  %s1157_s3 = inlined_call_operand.hbm [shape: f32[128,128], index: 3, kind: output, shape index: {0}]   ;;  %s1158_s4 = inlined_call_operand.vmem [shape: f32[128,1], index: 4, kind: output, shape index: {1}]  }
   0x1   :  { %v33_v0 = vld [vmem:[%s1155_s1] sm:$0xff]  ;;  %v34_v1 = vld [vmem:[%s1155_s1 + $0x8] sm:$0xff]  ;;  %v19_v7 = vld [vmem:[%s1154_s0 + $0x10] sm:$0xff] }
   0x2   :  { %v17_v2 = vld [vmem:[%s1154_s0] sm:$0xff]  ;;  %v624_v3 = vpack.c.bf16 %v34_v1, %v33_v0  ;;  %v18_v5 = vld [vmem:[%s1154_s0 + $0x8] sm:$0xff]  ;;  %v27_v8 = vld [vmem:[%s1154_s0 + $0x50] sm:$0xff] }
   0x3   :  { %600 = vmatprep.mubr.msk.f32.mxu0 %vm42_vm0, %v17_v2  ;;  %v25_v4 = vld [vmem:[%s1154_s0 + $0x40] sm:$0xff]  ;;  %v26_v6 = vld [vmem:[%s1154_s0 + $0x48] sm:$0xff] }
   0x4   :  { %612 = vmatprep.mubr.msk.f32.mxu1 %vm42_vm0, %v25_v4  ;;  %625 = vmatprep.subr.bf16.mxu0 %v624_v3 }
   0x5   :  { %628 = vmatprep.subr.bf16.mxu1 %v624_v3  ;;  %627 = vmatpush3.bf16.msra.mxu0 %v624_v3 }
   0x6   :  { %629 = vmatpush3.bf16.msra.mxu1 %v624_v3 }
   0x7   :  { %10 = vsyncpa [#allocation3], 0  ;;  %v20_v9 = vld [vmem:[%s1154_s0 + $0x18] sm:$0xff]  ;;  %v21_v11 = vld [vmem:[%s1154_s0 + $0x20] sm:$0xff] }
   0x8   :  { %601 = vmatmul.mubr.msk.f32.vlgmr.msra.gmra.mrb[0].mxu0 %vm42_vm0, %v18_v5  ;;  %v28_v10 = vld [vmem:[%s1154_s0 + $0x58] sm:$0xff]  ;;  %v29_v12 = vld [vmem:[%s1154_s0 + $0x60] sm:$0xff]  ;;  %v22_v13 = vld [vmem:[%s1154_s0 + $0x28] sm:$0xff] }
   0x9   :  { %613 = vmatmul.mubr.msk.f32.vlgmr.msra.gmra.mrb[0].mxu1 %vm42_vm0, %v26_v6  ;;  %603 = vmatprep.mubr.msk.f32.mxu0 %vm42_vm0, %v19_v7  ;;  %v30_v14 = vld [vmem:[%s1154_s0 + $0x68] sm:$0xff]  ;;  %v23_v15 = vld [vmem:[%s1154_s0 + $0x30] sm:$0xff]  ;;  %v24_v17 = vld [vmem:[%s1154_s0 + $0x38] sm:$0xff] }
   0xa   :  { %615 = vmatprep.mubr.msk.f32.mxu1 %vm42_vm0, %v27_v8  ;;  %v31_v16 = vld [vmem:[%s1154_s0 + $0x70] sm:$0xff]  ;;  %v32_v18 = vld [vmem:[%s1154_s0 + $0x78] sm:$0xff]  ;;  %v822_v19 = vld [vmem:[%s1156_s2] ss:$0 sm:$0xff]  ;;  %s721_s0 = smov [#allocation2]  }
   0xb   :  { %s546_s2 = sshll.u32 %s721_s0, 4  ;;  %s547_s2 = int_to_ptr.vmem [resolvable:$true] %s546_s2 }
   0xc   :  { %604 = vmatmul.mubr.msk.f32.gmra.mrb[2].mxu0 %vm42_vm0, %v20_v9  ;;  %s697_s25 = scalar_lea.vmem %s547_s2, 2048  ;;  %p702_p1 = scmp.lt.s32.totalorder %s547_s2, %s547_s2 }
   0xd   :  { %616 = vmatmul.mubr.msk.f32.gmra.mrb[2].mxu1 %vm42_vm0, %v28_v10  ;;  %606 = vmatprep.mubr.msk.f32.mxu0 %vm42_vm0, %v21_v11  ;;  %p698_p0 = scmp.ne.s32.totalorder %s547_s2, %s697_s25  ;;  %p703_p2 = scmp.lt.s32.totalorder %s697_s25, %s697_s25 }
   0xe   :  { %618 = vmatprep.mubr.msk.f32.mxu1 %vm42_vm0, %v29_v12 }
   0xf   :  { %p704_p3 = por %p703_p2, %p702_p1 }
  0x10   :  { %607 = vmatmul.mubr.msk.f32.gmra.mrb[4].mxu0 %vm42_vm0, %v22_v13 }
  0x11   :  { %619 = vmatmul.mubr.msk.f32.gmra.mrb[4].mxu1 %vm42_vm0, %v30_v14  ;;  %609 = vmatprep.mubr.msk.f32.mxu0 %vm42_vm0, %v23_v15  ;;  %p705_p4 = pnand %p704_p3, %p698_p0 }
  0x12   :  { %621 = vmatprep.mubr.msk.f32.mxu1 %vm42_vm0, %v31_v16 }
  0x14   :  { %610 = vmatmul.mubr.msk.f32.gmra.mrb[6].mxu0 %vm42_vm0, %v24_v17 }
  0x15   :  { %622 = vmatmul.mubr.msk.f32.gmra.mrb[6].mxu1 %vm42_vm0, %v32_v18 }
  0xdb   :  { %v602_v20 = vpop.f32.mrb[0].mxu0 }
  0xdc   :  { %v614_v21 = vpop.f32.mrb[0].mxu1  ;;  %v163_v22 = vadd.f32 %v602_v20, %v822_v19  ;;  %v157_v24 = vpop.f32.mrb[1].mxu0 }
  0xdd   :  { %v203_v23 = vadd.f32 %v614_v21, %v822_v19  ;;  %v197_v25 = vpop.f32.mrb[1].mxu1  ;;  %v158_v26 = vadd.f32 %v822_v19, %v157_v24 }
  0xde   :  { %v827_v27 = vmax.f32 %v163_v22, 0.0  ;;  %v198_v30 = vadd.f32 %v822_v19, %v197_v25 }
  0xdf   :  { %v829_v28 = vmax.f32 %v203_v23, 0.0  ;;  %v831_v29 = vmax.f32 %v158_v26, 0.0  ;;  %v605_v31 = vpop.f32.mrb[2].mxu0 }
  0xe0   :  { %v617_v32 = vpop.f32.mrb[2].mxu1  ;;  %v173_v33 = vadd.f32 %v605_v31, %v822_v19  ;;  %v167_v34 = vpop.f32.mrb[3].mxu0  ;;  %v253_v37 = vmul.f32 %v827_v27, %v827_v27  ;;  %v844_v41 = vmax.f32 %v198_v30, 0.0 }
  0xe1   :  { %v261_v35 = vmul.f32 %v829_v28, %v829_v28  ;;  %v213_v36 = vadd.f32 %v617_v32, %v822_v19  ;;  %v207_v38 = vpop.f32.mrb[3].mxu1  ;;  %v168_v44 = vadd.f32 %v822_v19, %v167_v34  ;;  %v252_v47 = vmul.f32 %v831_v29, %v831_v29 }
  0xe2   :  { %v840_v39 = vmax.f32 %v173_v33, 0.0  ;;  %270 = vadd.xlane.f32.xlu0 %v253_v37  ;;  %v208_v45 = vadd.f32 %v822_v19, %v207_v38  ;;  %v260_v57 = vmul.f32 %v844_v41, %v844_v41 }
  0xe3   :  { %286 = vadd.xlane.f32.xlu1 %v261_v35  ;;  %v842_v40 = vmax.f32 %v213_v36, 0.0  ;;  %v608_v42 = vpop.f32.mrb[4].mxu0  ;;  %v856_v55 = vmax.f32 %v168_v44, 0.0 }
  0xe4   :  { %v620_v43 = vpop.f32.mrb[4].mxu1  ;;  %v255_v46 = vmul.f32 %v840_v39, %v840_v39  ;;  %v177_v48 = vpop.f32.mrb[5].mxu0  ;;  %v183_v51 = vadd.f32 %v608_v42, %v822_v19  ;;  %v858_v56 = vmax.f32 %v208_v45, 0.0 }
  0xe5   :  { %v217_v49 = vpop.f32.mrb[5].mxu1  ;;  %v263_v50 = vmul.f32 %v842_v40, %v842_v40  ;;  %v178_v52 = vadd.f32 %v822_v19, %v177_v48  ;;  %v223_v60 = vadd.f32 %v620_v43, %v822_v19  ;;  %v254_v0 = vmul.f32 %v856_v55, %v856_v55 }
  0xe6   :  { %268 = vadd.xlane.f32.xlu0 %v252_v47  ;;  %v863_v61 = vmax.f32 %v183_v51, 0.0  ;;  %v218_v63 = vadd.f32 %v822_v19, %v217_v49  ;;  %v262_v1 = vmul.f32 %v858_v56, %v858_v56 }
  0xe7   :  { %274 = vadd.xlane.f32.xlu1 %v255_v46  ;;  %v611_v53 = vpop.f32.mrb[6].mxu0  ;;  %v865_v62 = vmax.f32 %v178_v52, 0.0  ;;  %v872_v2 = vmax.f32 %v223_v60, 0.0 }
  0xe8   :  { %v623_v54 = vpop.f32.mrb[6].mxu1  ;;  %v187_v58 = vpop.f32.mrb[7].mxu0  ;;  %v193_v3 = vadd.f32 %v611_v53, %v822_v19  ;;  %v875_v4 = vmax.f32 %v218_v63, 0.0  ;;  %v257_v5 = vmul.f32 %v863_v61, %v863_v61 }
  0xe9   :  { %v227_v59 = vpop.f32.mrb[7].mxu1  ;;  %v256_v6 = vmul.f32 %v865_v62, %v865_v62  ;;  %v188_v7 = vadd.f32 %v822_v19, %v187_v58  ;;  %v233_v8 = vadd.f32 %v623_v54, %v822_v19  ;;  %v265_v9 = vmul.f32 %v872_v2, %v872_v2 }
  0xea   :  { %284 = vadd.xlane.f32.xlu0 %v260_v57  ;;  %v885_v10 = vmax.f32 %v193_v3, 0.0  ;;  %v264_v12 = vmul.f32 %v875_v4, %v875_v4  ;;  %v228_v13 = vadd.f32 %v822_v19, %v227_v59 }
  0xeb   :  { %290 = vadd.xlane.f32.xlu1 %v263_v50  ;;  %v887_v11 = vmax.f32 %v188_v7, 0.0  ;;  %v892_v14 = vmax.f32 %v233_v8, 0.0 }
  0xec   :  { %v894_v15 = vmax.f32 %v228_v13, 0.0  ;;  %v259_v16 = vmul.f32 %v885_v10, %v885_v10 }
  0xed   :  { %v258_v17 = vmul.f32 %v887_v11, %v887_v11  ;;  %v267_v18 = vmul.f32 %v892_v14, %v892_v14 }
  0xee   :  { %288 = vadd.xlane.f32.xlu0 %v262_v1  ;;  %v266_v19 = vmul.f32 %v894_v15, %v894_v15 }
  0xef   :  { %272 = vadd.xlane.f32.xlu1 %v254_v0 }
  0xf2   :  { %276 = vadd.xlane.f32.xlu0 %v256_v6 }
  0xf3   :  { %278 = vadd.xlane.f32.xlu1 %v257_v5 }
  0xf6   :  { %292 = vadd.xlane.f32.xlu0 %v264_v12 }
  0xf7   :  { %294 = vadd.xlane.f32.xlu1 %v265_v9 }
  0xfa   :  { %280 = vadd.xlane.f32.xlu0 %v258_v17 }
  0xfb   :  { %282 = vadd.xlane.f32.xlu1 %v259_v16 }
  0xfe   :  { %296 = vadd.xlane.f32.xlu0 %v266_v19 }
  0xff   :  { %298 = vadd.xlane.f32.xlu1 %v267_v18 }
 0x16f   :  { %v271_v21 = vpop.xlane.xlu0 %270 }
 0x170   :  { %v287_v20 = vpop.xlane.xlu1 %286  ;;  %vm309_vm3 = vcmp.eq.f32.partialorder %v271_v21, inf  ;;  %vm311_vm4 = vcmp.eq.f32.partialorder %v271_v21, 0.0  ;;  %v312_v36 = vand.u32 2147483648, %v271_v21 }
 0x171   :  { %633 = vrsqrt.f32 %v287_v20  ;;  %vm365_vm1 = vcmp.eq.f32.partialorder %v287_v20, inf  ;;  %vm367_vm2 = vcmp.eq.f32.partialorder %v287_v20, 0.0  ;;  %v368_v34 = vand.u32 2147483648, %v287_v20 }
 0x172   :  { %635 = vrsqrt.f32 %v271_v21 }
 0x173   :  { %v904_v23 = vpop.xlane.xlu0 %268 }
 0x174   :  { %v275_v22 = vpop.xlane.xlu1 %274  ;;  %vm302_vm7 = vcmp.eq.f32.partialorder %v904_v23, inf  ;;  %vm304_vm8 = vcmp.eq.f32.partialorder %v904_v23, 0.0  ;;  %v305_v44 = vand.u32 2147483648, %v904_v23 }
 0x175   :  { %637 = vrsqrt.f32 %v275_v22  ;;  %vm323_vm5 = vcmp.eq.f32.partialorder %v275_v22, inf  ;;  %vm325_vm6 = vcmp.eq.f32.partialorder %v275_v22, 0.0  ;;  %v326_v38 = vand.u32 2147483648, %v275_v22 }
 0x176   :  { %639 = vrsqrt.f32 %v904_v23 }
 0x177   :  { %v909_v25 = vpop.xlane.xlu0 %284 }
 0x178   :  { %v907_v24 = vpop.xlane.xlu1 %290  ;;  %vm358_vm11 = vcmp.eq.f32.partialorder %v909_v25, inf  ;;  %vm360_vm12 = vcmp.eq.f32.partialorder %v909_v25, 0.0  ;;  %v361_v53 = vand.u32 2147483648, %v909_v25 }
 0x179   :  { %641 = vrsqrt.f32 %v907_v24  ;;  %vm379_vm9 = vcmp.eq.f32.partialorder %v907_v24, inf  ;;  %vm381_vm10 = vcmp.eq.f32.partialorder %v907_v24, 0.0  ;;  %v382_v50 = vand.u32 2147483648, %v907_v24 }
 0x17a   :  { %643 = vrsqrt.f32 %v909_v25 }
 0x17b   :  { %v634_v26 = vpop.eup %633  ;;  %v915_v32 = vpop.xlane.xlu0 %288 }
 0x17c   :  { %v636_v30 = vpop.eup %635  ;;  %v913_v31 = vpop.xlane.xlu1 %272  ;;  %v364_v33 = vmul.f32 %v634_v26, %v287_v20  ;;  %vm372_vm15 = vcmp.eq.f32.partialorder %v915_v32, inf  ;;  %vm374_vm0 = vcmp.eq.f32.partialorder %v915_v32, 0.0  ;;  %v375_v6 = vand.u32 2147483648, %v915_v32 }
 0x17d   :  { %v308_v35 = vmul.f32 %v636_v30, %v271_v21  ;;  %645 = vrsqrt.f32 %v913_v31  ;;  %vm316_vm13 = vcmp.eq.f32.partialorder %v913_v31, inf  ;;  %vm318_vm14 = vcmp.eq.f32.partialorder %v913_v31, 0.0 }
 0x17e   :  { %647 = vrsqrt.f32 %v915_v32  ;;  %v366_v47 = vsel %vm365_vm1, %v287_v20, %v364_v33  ;;  %v319_v60 = vand.u32 2147483648, %v913_v31 }
 0x17f   :  { %v638_v37 = vpop.eup %637  ;;  %v925_v46 = vpop.xlane.xlu0 %276  ;;  %v310_v48 = vsel %vm309_vm3, %v271_v21, %v308_v35  ;;  %v369_v57 = vsel %vm367_vm2, %v368_v34, %v366_v47 }
 0x180   :  { %v640_v42 = vpop.eup %639  ;;  %v322_v43 = vmul.f32 %v638_v37, %v275_v22  ;;  %v923_v45 = vpop.xlane.xlu1 %278  ;;  %v313_v58 = vsel %vm311_vm4, %v312_v36, %v310_v48  ;;  %v421_v8 = vadd.f32 1e-08, %v369_v57  ;;  %vm330_vm3 = vcmp.eq.f32.partialorder %v925_v46, inf }
 0x181   :  { %v301_v49 = vmul.f32 %v640_v42, %v904_v23  ;;  %649 = vrsqrt.f32 %v923_v45  ;;  %v413_v9 = vadd.f32 1e-08, %v313_v58  ;;  %vm337_vm1 = vcmp.eq.f32.partialorder %v923_v45, inf }
 0x182   :  { %651 = vrsqrt.f32 %v925_v46  ;;  %v324_v52 = vsel %vm323_vm5, %v275_v22, %v322_v43  ;;  %vm339_vm2 = vcmp.eq.f32.partialorder %v923_v45, 0.0  ;;  %v340_v19 = vand.u32 2147483648, %v923_v45 }
 0x183   :  { %v642_v51 = vpop.eup %641  ;;  %v946_v0 = vpop.xlane.xlu0 %292  ;;  %v303_v1 = vsel %vm302_vm7, %v904_v23, %v301_v49  ;;  %v327_v5 = vsel %vm325_vm6, %v326_v38, %v324_v52  ;;  %v333_v33 = vand.u32 2147483648, %v925_v46  ;;  %vm332_vm4 = vcmp.eq.f32.partialorder %v925_v46, 0.0 }
 0x184   :  { %v644_v54 = vpop.eup %643  ;;  %v378_v59 = vmul.f32 %v642_v51, %v907_v24  ;;  %v944_v63 = vpop.xlane.xlu1 %294  ;;  %v306_v16 = vsel %vm304_vm8, %v305_v44, %v303_v1  ;;  %v415_v22 = vadd.f32 1e-08, %v327_v5  ;;  %vm386_vm7 = vcmp.eq.f32.partialorder %v946_v0, inf }
 0x185   :  { %v357_v3 = vmul.f32 %v644_v54, %v909_v25  ;;  %653 = vrsqrt.f32 %v944_v63  ;;  %v412_v35 = vadd.f32 1e-08, %v306_v16  ;;  %vm393_vm5 = vcmp.eq.f32.partialorder %v944_v63, inf }
 0x186   :  { %655 = vrsqrt.f32 %v946_v0  ;;  %v380_v12 = vsel %vm379_vm9, %v907_v24, %v378_v59  ;;  %vm395_vm6 = vcmp.eq.f32.partialorder %v944_v63, 0.0  ;;  %v396_v42 = vand.u32 2147483648, %v944_v63 }
 0x187   :  { %v646_v7 = vpop.eup %645  ;;  %v359_v17 = vsel %vm358_vm11, %v909_v25, %v357_v3  ;;  %v972_v21 = vpop.xlane.xlu0 %280  ;;  %v383_v23 = vsel %vm381_vm10, %v382_v50, %v380_v12  ;;  %vm388_vm8 = vcmp.eq.f32.partialorder %v946_v0, 0.0  ;;  %v389_v51 = vand.u32 2147483648, %v946_v0 }
 0x188   :  { %v648_v13 = vpop.eup %647  ;;  %v315_v18 = vmul.f32 %v646_v7, %v913_v31  ;;  %v970_v20 = vpop.xlane.xlu1 %282  ;;  %v362_v36 = vsel %vm360_vm12, %v361_v53, %v359_v17  ;;  %v423_v44 = vadd.f32 1e-08, %v383_v23  ;;  %vm344_vm11 = vcmp.eq.f32.partialorder %v972_v21, inf }
 0x189   :  { %v371_v26 = vmul.f32 %v648_v13, %v915_v32  ;;  %657 = vrsqrt.f32 %v970_v20  ;;  %v420_v49 = vadd.f32 1e-08, %v362_v36  ;;  %vm351_vm9 = vcmp.eq.f32.partialorder %v970_v20, inf }
 0x18a   :  { %v317_v30 = vsel %vm316_vm13, %v913_v31, %v315_v18  ;;  %659 = vrsqrt.f32 %v972_v21  ;;  %vm353_vm10 = vcmp.eq.f32.partialorder %v970_v20, 0.0  ;;  %v354_v53 = vand.u32 2147483648, %v970_v20 }
 0x18b   :  { %v650_v34 = vpop.eup %649  ;;  %v373_v37 = vsel %vm372_vm15, %v915_v32, %v371_v26  ;;  %v997_v25 = vpop.xlane.xlu0 %296  ;;  %v320_v47 = vsel %vm318_vm14, %v319_v60, %v317_v30  ;;  %vm346_vm12 = vcmp.eq.f32.partialorder %v972_v21, 0.0  ;;  %v347_v5 = vand.u32 2147483648, %v972_v21 }
 0x18c   :  { %v652_v24 = vpop.eup %651  ;;  %v336_v38 = vmul.f32 %v650_v34, %v923_v45  ;;  %v995_v43 = vpop.xlane.xlu1 %298  ;;  %v376_v31 = vsel %vm374_vm0, %v375_v6, %v373_v37  ;;  %v414_v57 = vadd.f32 1e-08, %v320_v47  ;;  %vm400_vm15 = vcmp.eq.f32.partialorder %v997_v25, inf }
 0x18d   :  { %v329_v48 = vmul.f32 %v652_v24, %v925_v46  ;;  %661 = vrsqrt.f32 %v995_v43  ;;  %v422_v1 = vadd.f32 1e-08, %v376_v31  ;;  %vm407_vm13 = vcmp.eq.f32.partialorder %v995_v43, inf }
 0x18e   :  { %v338_v50 = vsel %vm337_vm1, %v923_v45, %v336_v38  ;;  %663 = vrsqrt.f32 %v997_v25  ;;  %vm409_vm14 = vcmp.eq.f32.partialorder %v995_v43, 0.0  ;;  %vm402_vm0 = vcmp.eq.f32.partialorder %v997_v25, 0.0 }
 0x18f   :  { %v654_v52 = vpop.eup %653  ;;  %v341_v59 = vsel %vm339_vm2, %v340_v19, %v338_v50  ;;  %v331_v32 = vsel %vm330_vm3, %v925_v46, %v329_v48  ;;  %665 = vrcp.f32 %v413_v9  ;;  %v403_v24 = vand.u32 2147483648, %v997_v25 }
 0x190   :  { %v656_v54 = vpop.eup %655  ;;  %v392_v58 = vmul.f32 %v654_v52, %v944_v63  ;;  %667 = vrcp.f32 %v421_v8  ;;  %v417_v12 = vadd.f32 1e-08, %v341_v59  ;;  %v334_v13 = vsel %vm332_vm4, %v333_v33, %v331_v32 }
 0x191   :  { %v385_v60 = vmul.f32 %v656_v54, %v946_v0  ;;  %669 = vrcp.f32 %v412_v35  ;;  %v416_v26 = vadd.f32 1e-08, %v334_v13 }
 0x192   :  { %v394_v3 = vsel %vm393_vm5, %v944_v63, %v392_v58  ;;  %671 = vrcp.f32 %v415_v22  ;;  %v410_v63 = vand.u32 2147483648, %v995_v43 }
 0x193   :  { %v658_v6 = vpop.eup %657  ;;  %v397_v45 = vsel %vm395_vm6, %v396_v42, %v394_v3  ;;  %v387_v7 = vsel %vm386_vm7, %v946_v0, %v385_v60  ;;  %673 = vrcp.f32 %v420_v49 }
 0x194   :  { %v660_v9 = vpop.eup %659  ;;  %v350_v16 = vmul.f32 %v658_v6, %v970_v20  ;;  %v425_v17 = vadd.f32 1e-08, %v397_v45  ;;  %v390_v18 = vsel %vm388_vm8, %v389_v51, %v387_v7  ;;  %675 = vrcp.f32 %v423_v44 }
 0x195   :  { %v343_v8 = vmul.f32 %v660_v9, %v972_v21  ;;  %677 = vrcp.f32 %v414_v57  ;;  %v424_v35 = vadd.f32 1e-08, %v390_v18 }
 0x196   :  { %v352_v19 = vsel %vm351_vm9, %v970_v20, %v350_v16  ;;  %679 = vrcp.f32 %v417_v12 }
 0x197   :  { %v662_v46 = vpop.eup %661  ;;  %v355_v22 = vsel %vm353_vm10, %v354_v53, %v352_v19  ;;  %v345_v23 = vsel %vm344_vm11, %v972_v21, %v343_v8  ;;  %681 = vrcp.f32 %v422_v1 }
 0x198   :  { %v664_v30 = vpop.eup %663  ;;  %v419_v33 = vadd.f32 1e-08, %v355_v22  ;;  %v348_v0 = vsel %vm346_vm12, %v347_v5, %v345_v23  ;;  %v406_v34 = vmul.f32 %v662_v46, %v995_v43  ;;  %683 = vrcp.f32 %v425_v17 }
 0x199   :  { %v399_v36 = vmul.f32 %v664_v30, %v997_v25  ;;  %v666_v21 = vpop.eup %665  ;;  %v418_v37 = vadd.f32 1e-08, %v348_v0  ;;  %685 = vrcp.f32 %v416_v26 }
 0x19a   :  { %v408_v20 = vsel %vm407_vm13, %v995_v43, %v406_v34  ;;  %v668_v44 = vpop.eup %667  ;;  %v445_v49 = vmul.f32 %v666_v21, %v827_v27  ;;  %687 = vrcp.f32 %v419_v33 }
 0x19b   :  { %v411_v38 = vsel %vm409_vm14, %v410_v63, %v408_v20  ;;  %v401_v42 = vsel %vm400_vm15, %v997_v25, %v399_v36  ;;  %v670_v50 = vpop.eup %669  ;;  %v453_v52 = vmul.f32 %v668_v44, %v829_v28  ;;  %689 = vrcp.f32 %v424_v35 }
 0x19c   :  { %v427_v47 = vadd.f32 1e-08, %v411_v38  ;;  %v404_v48 = vsel %vm402_vm0, %v403_v24, %v401_v42  ;;  %v672_v31 = vpop.eup %671  ;;  %461 = vst [vmem:[#allocation2 + $0x8] sm:$0xff] %v445_v49  ;;  %v477_v53 = vmul.f32 %v445_v49, %v445_v49  ;;  %v444_v43 = vmul.f32 %v670_v50, %v831_v29 }
 0x19d   :  { %v426_v51 = vadd.f32 1e-08, %v404_v48  ;;  %v674_v54 = vpop.eup %673  ;;  %469 = vst [vmem:[#allocation2 + $0x48] sm:$0xff] %v453_v52  ;;  %v447_v25 = vmul.f32 %v672_v31, %v840_v39  ;;  %v485_v60 = vmul.f32 %v453_v52, %v453_v52 }
 0x19e   :  { %691 = vrcp.f32 %v427_v47  ;;  %v676_v57 = vpop.eup %675  ;;  %494 = vadd.xlane.f32.xlu1 %v477_v53  ;;  %v476_v27 = vmul.f32 %v444_v43, %v444_v43  ;;  %460 = vst [vmem:[#allocation2] sm:$0xff] %v444_v43  ;;  %v452_v58 = vmul.f32 %v674_v54, %v844_v41 }
 0x19f   :  { %693 = vrcp.f32 %v418_v37  ;;  %v678_v28 = vpop.eup %677  ;;  %463 = vst [vmem:[#allocation2 + $0x18] sm:$0xff] %v447_v25  ;;  %v455_v59 = vmul.f32 %v676_v57, %v842_v40  ;;  %v479_v7 = vmul.f32 %v447_v25, %v447_v25 }
 0x1a0   :  { %695 = vrcp.f32 %v426_v51  ;;  %v680_v32 = vpop.eup %679  ;;  %492 = vadd.xlane.f32.xlu0 %v476_v27  ;;  %v484_v29 = vmul.f32 %v452_v58, %v452_v58  ;;  %468 = vst [vmem:[#allocation2 + $0x40] sm:$0xff] %v452_v58  ;;  %v446_v1 = vmul.f32 %v678_v28, %v856_v55 }
 0x1a1   :  { %v682_v39 = vpop.eup %681  ;;  %471 = vst [vmem:[#allocation2 + $0x58] sm:$0xff] %v455_v59  ;;  %v449_v3 = vmul.f32 %v680_v32, %v863_v61  ;;  %v487_v63 = vmul.f32 %v455_v59, %v455_v59 }
 0x1a2   :  { %v684_v5 = vpop.eup %683  ;;  %510 = vadd.xlane.f32.xlu1 %v485_v60  ;;  %462 = vst [vmem:[#allocation2 + $0x10] sm:$0xff] %v446_v1  ;;  %v454_v41 = vmul.f32 %v682_v39, %v858_v56  ;;  %v478_v9 = vmul.f32 %v446_v1, %v446_v1 }
 0x1a3   :  { %v686_v6 = vpop.eup %685  ;;  %465 = vst [vmem:[#allocation2 + $0x28] sm:$0xff] %v449_v3  ;;  %v457_v40 = vmul.f32 %v684_v5, %v872_v2 }
 0x1a4   :  { %v688_v45 = vpop.eup %687  ;;  %508 = vadd.xlane.f32.xlu0 %v484_v29  ;;  %470 = vst [vmem:[#allocation2 + $0x50] sm:$0xff] %v454_v41  ;;  %v448_v55 = vmul.f32 %v686_v6, %v865_v62  ;;  %v486_v18 = vmul.f32 %v454_v41, %v454_v41 }
 0x1a5   :  { %v690_v12 = vpop.eup %689  ;;  %473 = vst [vmem:[#allocation2 + $0x68] sm:$0xff] %v457_v40  ;;  %v451_v61 = vmul.f32 %v688_v45, %v885_v10  ;;  %v481_v10 = vmul.f32 %v449_v3, %v449_v3 }
 0x1a6   :  { %498 = vadd.xlane.f32.xlu1 %v479_v7  ;;  %464 = vst [vmem:[#allocation2 + $0x20] sm:$0xff] %v448_v55  ;;  %v456_v56 = vmul.f32 %v690_v12, %v875_v4  ;;  %v489_v4 = vmul.f32 %v457_v40, %v457_v40  ;;  %v480_v19 = vmul.f32 %v448_v55, %v448_v55 }
 0x1a7   :  { %467 = vst [vmem:[#allocation2 + $0x38] sm:$0xff] %v451_v61 }
 0x1a8   :  { %v692_v13 = vpop.eup %691  ;;  %496 = vadd.xlane.f32.xlu0 %v478_v9  ;;  %472 = vst [vmem:[#allocation2 + $0x60] sm:$0xff] %v456_v56  ;;  %v488_v46 = vmul.f32 %v456_v56, %v456_v56 }
 0x1a9   :  { %v694_v16 = vpop.eup %693  ;;  %v459_v2 = vmul.f32 %v692_v13, %v892_v14  ;;  %v483_v14 = vmul.f32 %v451_v61, %v451_v61 }
 0x1aa   :  { %v696_v8 = vpop.eup %695  ;;  %v450_v17 = vmul.f32 %v694_v16, %v887_v11  ;;  %514 = vadd.xlane.f32.xlu1 %v487_v63 }
 0x1ab   :  { %475 = vst [vmem:[#allocation2 + $0x78] sm:$0xff] %v459_v2  ;;  %v458_v62 = vmul.f32 %v696_v8, %v894_v15  ;;  %v491_v26 = vmul.f32 %v459_v2, %v459_v2 }
 0x1ac   :  { %466 = vst [vmem:[#allocation2 + $0x30] sm:$0xff] %v450_v17  ;;  %512 = vadd.xlane.f32.xlu0 %v486_v18  ;;  %v482_v11 = vmul.f32 %v450_v17, %v450_v17 }
 0x1ad   :  { %474 = vst [vmem:[#allocation2 + $0x70] sm:$0xff] %v458_v62  ;;  %v490_v15 = vmul.f32 %v458_v62, %v458_v62 }
 0x1ae   :  { %502 = vadd.xlane.f32.xlu1 %v481_v10 }
 0x1b0   :  { %500 = vadd.xlane.f32.xlu0 %v480_v19 }
 0x1b2   :  { %518 = vadd.xlane.f32.xlu1 %v489_v4 }
 0x1b4   :  { %516 = vadd.xlane.f32.xlu0 %v488_v46 }
 0x1b6   :  { %506 = vadd.xlane.f32.xlu1 %v483_v14 }
 0x1b8   :  { %504 = vadd.xlane.f32.xlu0 %v482_v11 }
 0x1ba   :  { %522 = vadd.xlane.f32.xlu1 %v491_v26 }
 0x1bc   :  { %520 = vadd.xlane.f32.xlu0 %v490_v15 }
 0x1bd   :  { %708 = shalt.err (!%p705_p4)
}
 0x1be   :  { %s709_s28 = scalar_lea.hbm %s1157_s3, 2048 }
 0x1bf   :  { %p710_p5 = scmp.ne.s32.totalorder %s1157_s3, %s709_s28  ;;  %p713_p6 = scmp.lt.u32.totalorder %s709_s28, %s1157_s3 }
 0x1c1   :  { %p715_p7 = pnand %p713_p6, %p710_p5 }
 0x1c3   :  { %718 = shalt.err (!%p715_p7)
}
 0x1c4   :  { %s722_s7 = smov 128   ;;  %s723_s8 = smov 8   ;;  %vm524_vm1 = vcmask 7168  }
 0x1c5   :  { %552 = dma.vmem_to_hbm [thread:$0]  %s547_s2, 2048, %s1157_s3, [#allocation3], %s722_s7, %s722_s7, %s723_s8  }
 0x22b   :  { %v495_v22 = vpop.xlane.xlu1 %494 }
 0x22c   :  { %526 = vst.msk [vmem:[%s1158_s4 + $0x8] sm:$0xff] %vm524_vm1, %v495_v22 }
 0x22d   :  { %v493_v23 = vpop.xlane.xlu0 %492 }
 0x22e   :  { %525 = vst.msk [vmem:[%s1158_s4] sm:$0xff] %vm524_vm1, %v493_v23 }
 0x22f   :  { %v511_v30 = vpop.xlane.xlu1 %510 }
 0x230   :  { %534 = vst.msk [vmem:[%s1158_s4 + $0x48] sm:$0xff] %vm524_vm1, %v511_v30 }
 0x231   :  { %v509_v33 = vpop.xlane.xlu0 %508 }
 0x232   :  { %533 = vst.msk [vmem:[%s1158_s4 + $0x40] sm:$0xff] %vm524_vm1, %v509_v33 }
 0x233   :  { %v499_v0 = vpop.xlane.xlu1 %498 }
 0x234   :  { %528 = vst.msk [vmem:[%s1158_s4 + $0x18] sm:$0xff] %vm524_vm1, %v499_v0 }
 0x235   :  { %v497_v34 = vpop.xlane.xlu0 %496 }
 0x236   :  { %527 = vst.msk [vmem:[%s1158_s4 + $0x10] sm:$0xff] %vm524_vm1, %v497_v34 }
 0x237   :  { %v515_v35 = vpop.xlane.xlu1 %514 }
 0x238   :  { %536 = vst.msk [vmem:[%s1158_s4 + $0x58] sm:$0xff] %vm524_vm1, %v515_v35 }
 0x239   :  { %v513_v36 = vpop.xlane.xlu0 %512 }
 0x23a   :  { %535 = vst.msk [vmem:[%s1158_s4 + $0x50] sm:$0xff] %vm524_vm1, %v513_v36 }
 0x23b   :  { %v503_v20 = vpop.xlane.xlu1 %502 }
 0x23c   :  { %530 = vst.msk [vmem:[%s1158_s4 + $0x28] sm:$0xff] %vm524_vm1, %v503_v20 }
 0x23d   :  { %v501_v24 = vpop.xlane.xlu0 %500 }
 0x23e   :  { %529 = vst.msk [vmem:[%s1158_s4 + $0x20] sm:$0xff] %vm524_vm1, %v501_v24 }
 0x23f   :  { %v519_v21 = vpop.xlane.xlu1 %518 }
 0x240   :  { %538 = vst.msk [vmem:[%s1158_s4 + $0x68] sm:$0xff] %vm524_vm1, %v519_v21 }
 0x241   :  { %v517_v37 = vpop.xlane.xlu0 %516 }
 0x242   :  { %537 = vst.msk [vmem:[%s1158_s4 + $0x60] sm:$0xff] %vm524_vm1, %v517_v37 }
 0x243   :  { %v507_v38 = vpop.xlane.xlu1 %506 }
 0x244   :  { %532 = vst.msk [vmem:[%s1158_s4 + $0x38] sm:$0xff] %vm524_vm1, %v507_v38 }
 0x245   :  { %v505_v42 = vpop.xlane.xlu0 %504 }
 0x246   :  { %531 = vst.msk [vmem:[%s1158_s4 + $0x30] sm:$0xff] %vm524_vm1, %v505_v42 }
 0x247   :  { %v523_v44 = vpop.xlane.xlu1 %522 }
 0x248   :  { %540 = vst.msk [vmem:[%s1158_s4 + $0x78] sm:$0xff] %vm524_vm1, %v523_v44 }
 0x249   :  { %v521_v47 = vpop.xlane.xlu0 %520 }
 0x24a   :  { %539 = vst.msk [vmem:[%s1158_s4 + $0x70] sm:$0xff] %vm524_vm1, %v521_v47 }
 0x24b   :  { %719 = dma.done.wait [#allocation3], 2048  }
 0x24c   :  { %720 = vsyncadd [#allocation3], 4294965248 }
 0x24d   :  { %560 = vsyncpa [#allocation3], 1 }

</bundles_post_ra>
